<compile_context>
chip_gen: v5e
topology: v5e:2x2
jax: 0.10.0
libtpu: 0.0.40
codegen_flags: <defaults>
</compile_context>

<pallas_src>
import jax
import jax.numpy as jnp
from jax.experimental import pallas as pl
from jax.experimental.pallas import tpu as pltpu


def _round_up(x, m):
    return (x + m - 1) // m * m


# --------------------------------------------------------------------------- #
# Kernel
# --------------------------------------------------------------------------- #
def _classifier_kernel(sent_ref, pwm_ref, adj_ref, sdm_ref, bert_ref,
                       w1_ref, b1_ref, w2_ref, b2_ref,
                       pooled_ref, alpha_ref, asum_ref, gcn_ref):
    BB, Sp, Dp = sent_ref.shape

    # --- normalized adjacency, shared by both GCN layers (bf16 for the MXU) ---
    adj = adj_ref[...]                                             # (BB, Sp, Sp)
    denom = jnp.sum(adj, axis=2, keepdims=True) + 1.0              # (BB, Sp, 1)
    adj_n = (adj * pl.reciprocal(denom, approx=True)).astype(jnp.bfloat16)

    pwm = pwm_ref[...]                                             # (BB, Sp, 2)
    posw = pwm[:, :, 0:1]                                          # position weight
    amask = pwm[:, :, 1:2]                                         # aspect mask

    # --- GCN stack.  gcn_ref doubles as the working buffer so only ONE
    # (BB,Sp,Dp) f32 value stays live across the two layers (VMEM pressure). ---
    gcn_ref[...] = posw * sent_ref[...]                            # weighted_x
    for w_ref, b_ref in ((w1_ref, b1_ref), (w2_ref, b2_ref)):
        xin = gcn_ref[...].astype(jnp.bfloat16)                    # (BB, Sp, Dp)
        # Sp % 8 == 0 and Dp % 128 == 0  =>  reshape is a free view.
        h = jnp.dot(xin.reshape(BB * Sp, Dp), w_ref[...],
                    preferred_element_type=jnp.float32).reshape(BB, Sp, Dp)
        o = jnp.einsum('bij,bjd->bid', adj_n, h.astype(jnp.bfloat16),
                       preferred_element_type=jnp.float32) + b_ref[...]
        gcn_ref[...] = jnp.maximum(o, 0.0)                         # ReLU

    # --- mask_nonaspect + sum(dim=1) -------------------------------------------
    asum = jnp.sum(amask * gcn_ref[...], axis=1)                   # (BB, Dp)
    asum_ref[...] = asum

    # --- fused attention: sum_i(aspect_x @ sent^T) + bert @ sent^T
    #                      == (asum + bert) @ sent^T.
    # o=1 matvecs as VPU broadcast-mul + reduce (no 1-row MXU matmuls). ---------
    sent = sent_ref[...]
    q = asum + bert_ref[...]                                       # (BB, Dp)
    mixed = jnp.sum(q[:, None, :] * sent, axis=2)                  # (BB, Sp)
    mixed = jnp.where(sdm_ref[...] == 0.0, -1.0e9, mixed)          # masked_fill
    m = jnp.max(mixed, axis=1, keepdims=True)
    e = jnp.exp(mixed - m)
    alpha = e * pl.reciprocal(jnp.sum(e, axis=1, keepdims=True), approx=True)
    alpha_ref[...] = alpha                                         # softmax(dim=2)

    # pooled representation (lane-dense, Dp wide); final Linear done in XLA.
    pooled_ref[...] = jnp.sum(alpha[:, :, None] * sent, axis=1)    # (BB, Dp)


# --------------------------------------------------------------------------- #
# VMEM budgeting
# --------------------------------------------------------------------------- #
def _per_batch_elem_vmem_bytes(Sp, Dp):
    """Approximate VMEM bytes per batch element: double-buffered tiles + temps."""
    lane = lambda n: max(_round_up(n, 128), 128)
    f32, bf16 = 4, 2
    tiles = (Sp * lane(Dp) * f32          # sentence
             + Sp * lane(2) * f32         # pos-weight / aspect-mask stack
             + Sp * lane(Sp) * f32        # rl_adj
             + lane(Sp) * f32             # syn-dist mask row
             + lane(Dp) * f32             # bert row
             + Sp * lane(Dp) * f32        # gcn_x out (also the working buffer)
             + 2 * lane(Dp) * f32         # pooled + asum out
             + lane(Sp) * f32)            # alpha out
    temps = (Sp * lane(Sp) * bf16         # adj_n (bf16)
             + Sp * lane(Dp) * bf16       # bf16 MXU staging
             + 2 * Sp * lane(Dp) * f32    # h / o live f32 values
             + 2 * Sp * lane(Dp) * f32)   # attention broadcast temporaries
    return 2 * tiles + temps


def _weights_vmem_bytes(Dp):
    # 2x(Dp,Dp) bf16 weights + 2x(1,Dp) f32 biases, double-buffered by pipeline.
    return 2 * (2 * Dp * Dp * 2 + 2 * 8 * Dp * 4)


# --------------------------------------------------------------------------- #
# Wrapper
# --------------------------------------------------------------------------- #
def classifier_forward(sentence, bert_out, rl_adj, aspect_double_idx,
                       text_len, aspect_len, syntax_distance, params,
                       batch_block=8):
    B, S, D = sentence.shape

    # Lane/sublane padding: D -> multiple of 128 (lanes), S -> multiple of 8.
    # TODO(synk): at large S, round Sp to 128 as well for fully lane-dense
    # adjacency / alpha blocks.
    Dp = _round_up(D, 128)
    Sp = _round_up(S, 8)

    # ---------- plain-JAX glue: position weights / aspect mask / syn mask ------
    j = jnp.arange(S)[None, :]                                     # (1, S)
    a0 = aspect_double_idx[:, 0:1]
    a1 = aspect_double_idx[:, 1:2]
    tl = text_len[:, None]
    al = aspect_len[:, None]
    cl = (tl - al).astype(jnp.float32)                             # context_len
    cl_safe = jnp.where(cl > 0, cl, 1.0)                           # guard /0
    w_left = 1.0 - (a0 - j).astype(jnp.float32) / cl_safe
    w_right = 1.0 - (j - a1).astype(jnp.float32) / cl_safe
    pos_w = jnp.where(j < a0, w_left,
             jnp.where(j <= a1, 0.0,
              jnp.where(j < tl, w_right, 0.0))).astype(jnp.float32)
    aspect_mask = ((j >= a0) & (j <= a1)).astype(jnp.float32)      # (B, S)
    pwm = jnp.stack([pos_w, aspect_mask], axis=-1)                 # (B, S, 2)
    sdm = (syntax_distance > -6).astype(jnp.float32)               # (B, S)

    # ---------- batch blocking sized from an explicit VMEM budget ---------------
    per = _per_batch_elem_vmem_bytes(Sp, Dp)
    w_bytes = _weights_vmem_bytes(Dp)
    budget = max((40 << 20) - w_bytes, per)        # headroom under v7x's 64 MiB
    bb = max(1, min(batch_block, budget // per))
    bb = min(bb, max(1, pl.cdiv(B, 2)))            # >= 2 grid steps when B allows (v7x 2 TCs)
    bb = max(8, (bb // 8) * 8)                     # 2-D out blocks need bb % 8 == 0
    nb = pl.cdiv(B, bb)
    Bp = nb * bb
    vmem_limit = int(min(56 << 20, max(32 << 20, w_bytes + bb * per + (8 << 20))))

    def pad_to(x, tgt):
        return jnp.pad(x, tuple((0, t - s) for s, t in zip(x.shape, tgt)))

    sent_p = pad_to(sentence.astype(jnp.float32), (Bp, Sp, Dp))
    pwm_p = pad_to(pwm, (Bp, Sp, 2))
    adj_p = pad_to(rl_adj.astype(jnp.float32), (Bp, Sp, Sp))
    sdm_p = pad_to(sdm, (Bp, Sp))
    bert_p = pad_to(bert_out.astype(jnp.float32), (Bp, Dp))

    # GCN weights in bf16 (MXU-native), zero-padded to Dp; biases stay f32.
    w1 = pad_to(params["gc1_w"].astype(jnp.float32), (Dp, Dp)).astype(jnp.bfloat16)
    w2 = pad_to(params["gc2_w"].astype(jnp.float32), (Dp, Dp)).astype(jnp.bfloat16)
    b1 = pad_to(params["gc1_b"].astype(jnp.float32), (Dp,)).reshape(1, Dp)
    b2 = pad_to(params["gc2_b"].astype(jnp.float32), (Dp,)).reshape(1, Dp)

    out_shapes = (
        jax.ShapeDtypeStruct((Bp, Dp), jnp.float32),      # pooled (pre-FC)
        jax.ShapeDtypeStruct((Bp, Sp), jnp.float32),      # alpha
        jax.ShapeDtypeStruct((Bp, Dp), jnp.float32),      # aspect_x.sum(dim=1)
        jax.ShapeDtypeStruct((Bp, Sp, Dp), jnp.float32),  # gcn_x
    )

    # TODO(synk): on v7x, single-buffer the grid-invariant weight/bias blocks
    # (pipeline_mode=pl.Buffered(1)) to halve their footprint once confirmed
    # supported by the top-level pipeliner; kept double-buffered here and
    # accounted for in w_bytes.
    pooled_p, alpha_p, asum_p, gcn_p = pl.pallas_call(
        _classifier_kernel,
        out_shape=out_shapes,
        grid=(nb,),
        in_specs=[
            pl.BlockSpec((bb, Sp, Dp), lambda b: (b, 0, 0)),   # sentence
            pl.BlockSpec((bb, Sp, 2), lambda b: (b, 0, 0)),    # pos_w + aspect mask
            pl.BlockSpec((bb, Sp, Sp), lambda b: (b, 0, 0)),   # rl_adj
            pl.BlockSpec((bb, Sp), lambda b: (b, 0)),          # syn-dist mask
            pl.BlockSpec((bb, Dp), lambda b: (b, 0)),          # bert_out
            pl.BlockSpec((Dp, Dp), lambda b: (0, 0)),          # gc1 weight (bf16)
            pl.BlockSpec((1, Dp), lambda b: (0, 0)),           # gc1 bias
            pl.BlockSpec((Dp, Dp), lambda b: (0, 0)),          # gc2 weight (bf16)
            pl.BlockSpec((1, Dp), lambda b: (0, 0)),           # gc2 bias
        ],
        out_specs=(
            pl.BlockSpec((bb, Dp), lambda b: (b, 0)),          # pooled
            pl.BlockSpec((bb, Sp), lambda b: (b, 0)),          # alpha
            pl.BlockSpec((bb, Dp), lambda b: (b, 0)),          # asum
            pl.BlockSpec((bb, Sp, Dp), lambda b: (b, 0, 0)),   # gcn_x
        ),
        compiler_params=pltpu.CompilerParams(
            dimension_semantics=("parallel",),
            vmem_limit_bytes=vmem_limit),
    )(sent_p, pwm_p, adj_p, sdm_p, bert_p, w1, b1, w2, b2)

    # Final Linear in plain JAX: lane-thin (P=3) output as one batched matmul.
    pooled = pooled_p[:B, :D]
    logits = jnp.dot(pooled, params["fc_w"].T,
                     preferred_element_type=jnp.float32) + params["fc_b"]

    # matches torch return: (logits, alpha.squeeze(1), aspect_x.sum(dim=1), gcn_x)
    return logits, alpha_p[:B, :S], asum_p[:B, :D], gcn_p[:B, :S, :D]


if __name__ == "__main__":
    key = jax.random.PRNGKey(0)
    B, S, H, P = 2, 8, 32, 3          # batch, seq, opt.hidden_dim, opt.polarities_dim
    D = 2 * H                         # GCN feature width = 2*hidden_dim

    ks = jax.random.split(key, 9)
    sentence = jax.random.normal(ks[0], (B, S, D), dtype=jnp.float32)
    bert_out = jax.random.normal(ks[1], (B, D), dtype=jnp.float32)
    rl_adj = (jax.random.uniform(ks[2], (B, S, S)) > 0.5).astype(jnp.float32)
    aspect_double_idx = jnp.array([[2, 3], [1, 2]], dtype=jnp.int32)
    text_len = jnp.array([7, 6], dtype=jnp.int32)
    aspect_len = jnp.array([2, 2], dtype=jnp.int32)
    syntax_distance = jax.random.randint(ks[3], (B, S), -8, 5).astype(jnp.float32)

    # deterministic synthetic parameters (module shapes from __init__)
    params = {
        "gc1_w": 0.1 * jax.random.normal(ks[4], (D, D), dtype=jnp.float32),
        "gc1_b": 0.01 * jax.random.normal(ks[5], (D,), dtype=jnp.float32),
        "gc2_w": 0.1 * jax.random.normal(ks[6], (D, D), dtype=jnp.float32),
        "gc2_b": 0.01 * jax.random.normal(ks[7], (D,), dtype=jnp.float32),
        # fc: uniform_(-0.002, 0.002) weight, zero bias (reset_parameters)
        "fc_w": jax.random.uniform(ks[8], (P, D), minval=-0.002, maxval=0.002,
                                   dtype=jnp.float32),
        "fc_b": jnp.zeros((P,), jnp.float32),
    }

    outs = classifier_forward(sentence, bert_out, rl_adj, aspect_double_idx,
                              text_len, aspect_len, syntax_distance, params)
    outs = jax.tree_util.tree_map(jax.block_until_ready, outs)
    print("KERNEL_OK")
</pallas_src>

<mosaic_0001>
module attributes {stable_mosaic.version = 11 : i64} {
  func.func @_classifier_kernel(%arg0: i32, %arg1: memref<8x8x128xf32, #tpu.memory_space<vmem>>, %arg2: memref<8x8x2xf32, #tpu.memory_space<vmem>>, %arg3: memref<8x8x8xf32, #tpu.memory_space<vmem>>, %arg4: memref<8x8xf32, #tpu.memory_space<vmem>>, %arg5: memref<8x128xf32, #tpu.memory_space<vmem>>, %arg6: memref<128x128xbf16, #tpu.memory_space<vmem>>, %arg7: memref<1x128xf32, #tpu.memory_space<vmem>>, %arg8: memref<128x128xbf16, #tpu.memory_space<vmem>>, %arg9: memref<1x128xf32, #tpu.memory_space<vmem>>, %arg10: memref<8x128xf32, #tpu.memory_space<vmem>>, %arg11: memref<8x8xf32, #tpu.memory_space<vmem>>, %arg12: memref<8x128xf32, #tpu.memory_space<vmem>>, %arg13: memref<8x8x128xf32, #tpu.memory_space<vmem>>) attributes {dimension_semantics = [#tpu.dimension_semantics<parallel>], iteration_bounds = array<i64: 1>, scalar_prefetch = 0 : i64, scratch_operands = 0 : i64, tpu.core_type = #tpu.core_type<tc>, window_params = [{transform_indices = @transform_0, window_bounds = array<i64: 8, 8, 128>}, {transform_indices = @transform_1, window_bounds = array<i64: 8, 8, 2>}, {transform_indices = @transform_2, window_bounds = array<i64: 8, 8, 8>}, {transform_indices = @transform_3, window_bounds = array<i64: 8, 8>}, {transform_indices = @transform_4, window_bounds = array<i64: 8, 128>}, {pipeline_mode = #tpu.pipeline_mode<synchronous>, transform_indices = @transform_5, window_bounds = array<i64: 128, 128>}, {pipeline_mode = #tpu.pipeline_mode<synchronous>, transform_indices = @transform_6, window_bounds = array<i64: 1, 128>}, {pipeline_mode = #tpu.pipeline_mode<synchronous>, transform_indices = @transform_7, window_bounds = array<i64: 128, 128>}, {pipeline_mode = #tpu.pipeline_mode<synchronous>, transform_indices = @transform_8, window_bounds = array<i64: 1, 128>}, {transform_indices = @transform_9, window_bounds = array<i64: 8, 128>}, {transform_indices = @transform_10, window_bounds = array<i64: 8, 8>}, {transform_indices = @transform_11, window_bounds = array<i64: 8, 128>}, {transform_indices = @transform_12, window_bounds = array<i64: 8, 8, 128>}]} {
    %c0 = arith.constant 0 : index
    %c0_0 = arith.constant 0 : index
    %c0_1 = arith.constant 0 : index
    %0 = vector.load %arg3[%c0, %c0_0, %c0_1] : memref<8x8x8xf32, #tpu.memory_space<vmem>>, vector<8x8x8xf32>
    %cst = arith.constant dense<0.000000e+00> : vector<8x8xf32>
    %1 = vector.multi_reduction <add>, %0, %cst [2] : vector<8x8x8xf32> to vector<8x8xf32>
    %2 = vector.shape_cast %1 : vector<8x8xf32> to vector<8x8x1xf32>
    %cst_2 = arith.constant 1.000000e+00 : f32
    %3 = vector.broadcast %cst_2 : f32 to vector<8x8x1xf32>
    %4 = arith.addf %2, %3 : vector<8x8x1xf32>
    %5 = tpu.reciprocal %4 {approx = true} : vector<8x8x1xf32> -> vector<8x8x1xf32>
    %6 = vector.broadcast %5 : vector<8x8x1xf32> to vector<8x8x8xf32>
    %7 = arith.mulf %0, %6 : vector<8x8x8xf32>
    %8 = arith.truncf %7 : vector<8x8x8xf32> to vector<8x8x8xbf16>
    %c0_3 = arith.constant 0 : index
    %c0_4 = arith.constant 0 : index
    %c0_5 = arith.constant 0 : index
    %9 = vector.load %arg2[%c0_3, %c0_4, %c0_5] : memref<8x8x2xf32, #tpu.memory_space<vmem>>, vector<8x8x2xf32>
    %10 = vector.extract_strided_slice %9 {offsets = [0, 0, 0], sizes = [8, 8, 1], strides = [1, 1, 1]} : vector<8x8x2xf32> to vector<8x8x1xf32>
    %11 = vector.extract_strided_slice %9 {offsets = [0, 0, 1], sizes = [8, 8, 1], strides = [1, 1, 1]} : vector<8x8x2xf32> to vector<8x8x1xf32>
    %c0_6 = arith.constant 0 : index
    %c0_7 = arith.constant 0 : index
    %c0_8 = arith.constant 0 : index
    %12 = vector.load %arg1[%c0_6, %c0_7, %c0_8] : memref<8x8x128xf32, #tpu.memory_space<vmem>>, vector<8x8x128xf32>
    %13 = vector.broadcast %10 : vector<8x8x1xf32> to vector<8x8x128xf32>
    %14 = arith.mulf %13, %12 : vector<8x8x128xf32>
    %c0_9 = arith.constant 0 : index
    %c0_10 = arith.constant 0 : index
    %c0_11 = arith.constant 0 : index
    %15 = vector.load %arg13[%c0_9, %c0_10, %c0_11] : memref<8x8x128xf32, #tpu.memory_space<vmem>>, vector<8x8x128xf32>
    tpu.vector_store %arg13[%c0_9, %c0_10, %c0_11], %14 {strides = array<i32>} : memref<8x8x128xf32, #tpu.memory_space<vmem>>, vector<8x8x128xf32>,
    %c0_12 = arith.constant 0 : index
    %c0_13 = arith.constant 0 : index
    %c0_14 = arith.constant 0 : index
    %16 = vector.load %arg13[%c0_12, %c0_13, %c0_14] : memref<8x8x128xf32, #tpu.memory_space<vmem>>, vector<8x8x128xf32>
    %17 = arith.truncf %16 : vector<8x8x128xf32> to vector<8x8x128xbf16>
    %18 = vector.shape_cast %17 : vector<8x8x128xbf16> to vector<64x128xbf16>
    %c0_15 = arith.constant 0 : index
    %c0_16 = arith.constant 0 : index
    %19 = vector.load %arg6[%c0_15, %c0_16] : memref<128x128xbf16, #tpu.memory_space<vmem>>, vector<128x128xbf16>
    %cst_17 = arith.constant dense<0.000000e+00> : vector<64x128xf32>
    %20 = tpu.matmul %18, %19, %cst_17 {dimension_numbers = #tpu.dot_dimension_numbers<[1], [0], [0], [1], [0, 0, 1, 1], [], []>} : vector<64x128xbf16>, vector<128x128xbf16>, vector<64x128xf32> -> vector<64x128xf32>
    %21 = vector.shape_cast %20 : vector<64x128xf32> to vector<8x8x128xf32>
    %22 = arith.truncf %21 : vector<8x8x128xf32> to vector<8x8x128xbf16>
    "tpu.trace_start"() <{level = 10 : i32, message = "bij,bjd->bid"}> : () -> ()
    %cst_18 = arith.constant dense<0.000000e+00> : vector<8x8x128xf32>
    %23 = tpu.matmul %8, %22, %cst_18 {dimension_numbers = #tpu.dot_dimension_numbers<[2], [1], [1], [2], [0, 0, 0, 1, 1, 2], [0], [0]>} : vector<8x8x8xbf16>, vector<8x8x128xbf16>, vector<8x8x128xf32> -> vector<8x8x128xf32>
    "tpu.trace_stop"() : () -> ()
    %c0_19 = arith.constant 0 : index
    %c0_20 = arith.constant 0 : index
    %24 = vector.load %arg7[%c0_19, %c0_20] : memref<1x128xf32, #tpu.memory_space<vmem>>, vector<1x128xf32>
    %25 = vector.shape_cast %24 : vector<1x128xf32> to vector<1x1x128xf32>
    %26 = vector.broadcast %25 : vector<1x1x128xf32> to vector<8x8x128xf32>
    %27 = arith.addf %23, %26 : vector<8x8x128xf32>
    %cst_21 = arith.constant 0.000000e+00 : f32
    %28 = vector.broadcast %cst_21 : f32 to vector<8x8x128xf32>
    %29 = arith.maximumf %27, %28 : vector<8x8x128xf32>
    %c0_22 = arith.constant 0 : index
    %c0_23 = arith.constant 0 : index
    %c0_24 = arith.constant 0 : index
    %30 = vector.load %arg13[%c0_22, %c0_23, %c0_24] : memref<8x8x128xf32, #tpu.memory_space<vmem>>, vector<8x8x128xf32>
    tpu.vector_store %arg13[%c0_22, %c0_23, %c0_24], %29 {strides = array<i32>} : memref<8x8x128xf32, #tpu.memory_space<vmem>>, vector<8x8x128xf32>,
    %c0_25 = arith.constant 0 : index
    %c0_26 = arith.constant 0 : index
    %c0_27 = arith.constant 0 : index
    %31 = vector.load %arg13[%c0_25, %c0_26, %c0_27] : memref<8x8x128xf32, #tpu.memory_space<vmem>>, vector<8x8x128xf32>
    %32 = arith.truncf %31 : vector<8x8x128xf32> to vector<8x8x128xbf16>
    %33 = vector.shape_cast %32 : vector<8x8x128xbf16> to vector<64x128xbf16>
    %c0_28 = arith.constant 0 : index
    %c0_29 = arith.constant 0 : index
    %34 = vector.load %arg8[%c0_28, %c0_29] : memref<128x128xbf16, #tpu.memory_space<vmem>>, vector<128x128xbf16>
    %cst_30 = arith.constant dense<0.000000e+00> : vector<64x128xf32>
    %35 = tpu.matmul %33, %34, %cst_30 {dimension_numbers = #tpu.dot_dimension_numbers<[1], [0], [0], [1], [0, 0, 1, 1], [], []>} : vector<64x128xbf16>, vector<128x128xbf16>, vector<64x128xf32> -> vector<64x128xf32>
    %36 = vector.shape_cast %35 : vector<64x128xf32> to vector<8x8x128xf32>
    %37 = arith.truncf %36 : vector<8x8x128xf32> to vector<8x8x128xbf16>
    "tpu.trace_start"() <{level = 10 : i32, message = "bij,bjd->bid"}> : () -> ()
    %cst_31 = arith.constant dense<0.000000e+00> : vector<8x8x128xf32>
    %38 = tpu.matmul %8, %37, %cst_31 {dimension_numbers = #tpu.dot_dimension_numbers<[2], [1], [1], [2], [0, 0, 0, 1, 1, 2], [0], [0]>} : vector<8x8x8xbf16>, vector<8x8x128xbf16>, vector<8x8x128xf32> -> vector<8x8x128xf32>
    "tpu.trace_stop"() : () -> ()
    %c0_32 = arith.constant 0 : index
    %c0_33 = arith.constant 0 : index
    %39 = vector.load %arg9[%c0_32, %c0_33] : memref<1x128xf32, #tpu.memory_space<vmem>>, vector<1x128xf32>
    %40 = vector.shape_cast %39 : vector<1x128xf32> to vector<1x1x128xf32>
    %41 = vector.broadcast %40 : vector<1x1x128xf32> to vector<8x8x128xf32>
    %42 = arith.addf %38, %41 : vector<8x8x128xf32>
    %cst_34 = arith.constant 0.000000e+00 : f32
    %43 = vector.broadcast %cst_34 : f32 to vector<8x8x128xf32>
    %44 = arith.maximumf %42, %43 : vector<8x8x128xf32>
    %c0_35 = arith.constant 0 : index
    %c0_36 = arith.constant 0 : index
    %c0_37 = arith.constant 0 : index
    %45 = vector.load %arg13[%c0_35, %c0_36, %c0_37] : memref<8x8x128xf32, #tpu.memory_space<vmem>>, vector<8x8x128xf32>
    tpu.vector_store %arg13[%c0_35, %c0_36, %c0_37], %44 {strides = array<i32>} : memref<8x8x128xf32, #tpu.memory_space<vmem>>, vector<8x8x128xf32>,
    %c0_38 = arith.constant 0 : index
    %c0_39 = arith.constant 0 : index
    %c0_40 = arith.constant 0 : index
    %46 = vector.load %arg13[%c0_38, %c0_39, %c0_40] : memref<8x8x128xf32, #tpu.memory_space<vmem>>, vector<8x8x128xf32>
    %47 = vector.broadcast %11 : vector<8x8x1xf32> to vector<8x8x128xf32>
    %48 = arith.mulf %47, %46 : vector<8x8x128xf32>
    %cst_41 = arith.constant dense<0.000000e+00> : vector<8x128xf32>
    %49 = vector.multi_reduction <add>, %48, %cst_41 [1] : vector<8x8x128xf32> to vector<8x128xf32>
    %c0_42 = arith.constant 0 : index
    %c0_43 = arith.constant 0 : index
    %50 = vector.load %arg12[%c0_42, %c0_43] : memref<8x128xf32, #tpu.memory_space<vmem>>, vector<8x128xf32>
    tpu.vector_store %arg12[%c0_42, %c0_43], %49 {strides = array<i32>} : memref<8x128xf32, #tpu.memory_space<vmem>>, vector<8x128xf32>,
    %c0_44 = arith.constant 0 : index
    %c0_45 = arith.constant 0 : index
    %c0_46 = arith.constant 0 : index
    %51 = vector.load %arg1[%c0_44, %c0_45, %c0_46] : memref<8x8x128xf32, #tpu.memory_space<vmem>>, vector<8x8x128xf32>
    %c0_47 = arith.constant 0 : index
    %c0_48 = arith.constant 0 : index
    %52 = vector.load %arg5[%c0_47, %c0_48] : memref<8x128xf32, #tpu.memory_space<vmem>>, vector<8x128xf32>
    %53 = arith.addf %49, %52 : vector<8x128xf32>
    %54 = vector.shape_cast %53 : vector<8x128xf32> to vector<8x1x128xf32>
    %55 = vector.broadcast %54 : vector<8x1x128xf32> to vector<8x8x128xf32>
    %56 = arith.mulf %55, %51 : vector<8x8x128xf32>
    %cst_49 = arith.constant dense<0.000000e+00> : vector<8x8xf32>
    %57 = vector.multi_reduction <add>, %56, %cst_49 [2] : vector<8x8x128xf32> to vector<8x8xf32>
    %c0_50 = arith.constant 0 : index
    %c0_51 = arith.constant 0 : index
    %58 = vector.load %arg4[%c0_50, %c0_51] : memref<8x8xf32, #tpu.memory_space<vmem>>, vector<8x8xf32>
    %cst_52 = arith.constant 0.000000e+00 : f32
    %59 = vector.broadcast %cst_52 : f32 to vector<8x8xf32>
    %60 = arith.cmpf oeq, %58, %59 : vector<8x8xf32>
    %cst_53 = arith.constant -1.000000e+09 : f32
    %61 = vector.broadcast %cst_53 : f32 to vector<8x8xf32>
    %62 = arith.select %60, %61, %57 : vector<8x8xi1>, vector<8x8xf32>
    %cst_54 = arith.constant dense<0xFF800000> : vector<8xf32>
    %63 = vector.multi_reduction <maximumf>, %62, %cst_54 [1] : vector<8x8xf32> to vector<8xf32>
    %64 = vector.shape_cast %63 : vector<8xf32> to vector<8x1xf32>
    %65 = vector.broadcast %64 : vector<8x1xf32> to vector<8x8xf32>
    %66 = arith.subf %62, %65 : vector<8x8xf32>
    %67 = math.exp %66 : vector<8x8xf32>
    %cst_55 = arith.constant dense<0.000000e+00> : vector<8xf32>
    %68 = vector.multi_reduction <add>, %67, %cst_55 [1] : vector<8x8xf32> to vector<8xf32>
    %69 = vector.shape_cast %68 : vector<8xf32> to vector<8x1xf32>
    %70 = tpu.reciprocal %69 {approx = true} : vector<8x1xf32> -> vector<8x1xf32>
    %71 = vector.broadcast %70 : vector<8x1xf32> to vector<8x8xf32>
    %72 = arith.mulf %67, %71 : vector<8x8xf32>
    %c0_56 = arith.constant 0 : index
    %c0_57 = arith.constant 0 : index
    %73 = vector.load %arg11[%c0_56, %c0_57] : memref<8x8xf32, #tpu.memory_space<vmem>>, vector<8x8xf32>
    tpu.vector_store %arg11[%c0_56, %c0_57], %72 {strides = array<i32>} : memref<8x8xf32, #tpu.memory_space<vmem>>, vector<8x8xf32>,
    %74 = vector.shape_cast %72 : vector<8x8xf32> to vector<8x8x1xf32>
    %75 = vector.broadcast %74 : vector<8x8x1xf32> to vector<8x8x128xf32>
    %76 = arith.mulf %75, %51 : vector<8x8x128xf32>
    %cst_58 = arith.constant dense<0.000000e+00> : vector<8x128xf32>
    %77 = vector.multi_reduction <add>, %76, %cst_58 [1] : vector<8x8x128xf32> to vector<8x128xf32>
    %c0_59 = arith.constant 0 : index
    %c0_60 = arith.constant 0 : index
    %78 = vector.load %arg10[%c0_59, %c0_60] : memref<8x128xf32, #tpu.memory_space<vmem>>, vector<8x128xf32>
    tpu.vector_store %arg10[%c0_59, %c0_60], %77 {strides = array<i32>} : memref<8x128xf32, #tpu.memory_space<vmem>>, vector<8x128xf32>,
    return
  }
  func.func @transform_0(%arg0: i32) -> (i32, i32, i32) {
    %c0_i32 = arith.constant 0 : i32
    %c0_i32_0 = arith.constant 0 : i32
    %c0_i32_1 = arith.constant 0 : i32
    return %arg0, %c0_i32, %c0_i32_0 : i32, i32, i32
  }
  func.func @transform_1(%arg0: i32) -> (i32, i32, i32) {
    %c0_i32 = arith.constant 0 : i32
    %c0_i32_0 = arith.constant 0 : i32
    %c0_i32_1 = arith.constant 0 : i32
    return %arg0, %c0_i32, %c0_i32_0 : i32, i32, i32
  }
  func.func @transform_2(%arg0: i32) -> (i32, i32, i32) {
    %c0_i32 = arith.constant 0 : i32
    %c0_i32_0 = arith.constant 0 : i32
    %c0_i32_1 = arith.constant 0 : i32
    return %arg0, %c0_i32, %c0_i32_0 : i32, i32, i32
  }
  func.func @transform_3(%arg0: i32) -> (i32, i32) {
    %c0_i32 = arith.constant 0 : i32
    %c0_i32_0 = arith.constant 0 : i32
    return %arg0, %c0_i32 : i32, i32
  }
  func.func @transform_4(%arg0: i32) -> (i32, i32) {
    %c0_i32 = arith.constant 0 : i32
    %c0_i32_0 = arith.constant 0 : i32
    return %arg0, %c0_i32 : i32, i32
  }
  func.func @transform_5(%arg0: i32) -> (i32, i32) {
    %c0_i32 = arith.constant 0 : i32
    %c0_i32_0 = arith.constant 0 : i32
    %c0_i32_1 = arith.constant 0 : i32
    return %c0_i32, %c0_i32_0 : i32, i32
  }
  func.func @transform_6(%arg0: i32) -> (i32, i32) {
    %c0_i32 = arith.constant 0 : i32
    %c0_i32_0 = arith.constant 0 : i32
    %c0_i32_1 = arith.constant 0 : i32
    return %c0_i32, %c0_i32_0 : i32, i32
  }
  func.func @transform_7(%arg0: i32) -> (i32, i32) {
    %c0_i32 = arith.constant 0 : i32
    %c0_i32_0 = arith.constant 0 : i32
    %c0_i32_1 = arith.constant 0 : i32
    return %c0_i32, %c0_i32_0 : i32, i32
  }
  func.func @transform_8(%arg0: i32) -> (i32, i32) {
    %c0_i32 = arith.constant 0 : i32
    %c0_i32_0 = arith.constant 0 : i32
    %c0_i32_1 = arith.constant 0 : i32
    return %c0_i32, %c0_i32_0 : i32, i32
  }
  func.func @transform_9(%arg0: i32) -> (i32, i32) {
    %c0_i32 = arith.constant 0 : i32
    %c0_i32_0 = arith.constant 0 : i32
    return %arg0, %c0_i32 : i32, i32
  }
  func.func @transform_10(%arg0: i32) -> (i32, i32) {
    %c0_i32 = arith.constant 0 : i32
    %c0_i32_0 = arith.constant 0 : i32
    return %arg0, %c0_i32 : i32, i32
  }
  func.func @transform_11(%arg0: i32) -> (i32, i32) {
    %c0_i32 = arith.constant 0 : i32
    %c0_i32_0 = arith.constant 0 : i32
    return %arg0, %c0_i32 : i32, i32
  }
  func.func @transform_12(%arg0: i32) -> (i32, i32, i32) {
    %c0_i32 = arith.constant 0 : i32
    %c0_i32_0 = arith.constant 0 : i32
    %c0_i32_1 = arith.constant 0 : i32
    return %arg0, %c0_i32, %c0_i32_0 : i32, i32, i32
  }
}

</mosaic_0001>

<bundles_post_ra>
// kernel: tpu_custom_call.1
= control target key start
LH: loop header
LB: loop body
LE: loop exit
PB: predicated region body
PF: predicated region fallthrough
CT: control target
= control target key end

     0   :  { %18 = vsyncpa [#allocation3], 0  ;;  %s1970_s0 = inlined_call_operand.vmem [shape: f32[8,8,128], index: 0, kind: input, shape index: {}]   ;;  %s1971_s1 = inlined_call_operand.vmem [shape: f32[8,8,2], index: 1, kind: input, shape index: {}]   ;;  %s1972_s2 = inlined_call_operand.hbm [shape: f32[8,8,8], index: 2, kind: input, shape index: {}]   ;;  %s1973_s3 = inlined_call_operand.vmem [shape: f32[8,8], index: 3, kind: input, shape index: {}]   ;;  %s1974_s4 = inlined_call_operand.vmem [shape: f32[8,128], index: 4, kind: input, shape index: {}]   ;;  %s1975_s5 = inlined_call_operand.hbm [shape: bf16[128,128], index: 5, kind: input, shape index: {}]   ;;  %s1976_s6 = inlined_call_operand.vmem [shape: f32[1,128], index: 6, kind: input, shape index: {}]   ;;  %s1977_s7 = inlined_call_operand.hbm [shape: bf16[128,128], index: 7, kind: input, shape index: {}]   ;;  %s1978_s8 = inlined_call_operand.vmem [shape: f32[1,128], index: 8, kind: input, shape index: {}]   ;;  %s1979_s9 = inlined_call_operand.hbm [shape: f32[8,128], index: 9, kind: output, shape index: {0}]   ;;  %s1980_s10 = inlined_call_operand.hbm [shape: f32[8,8], index: 10, kind: output, shape index: {1}]   ;;  %s1981_s11 = inlined_call_operand.hbm [shape: f32[8,128], index: 11, kind: output, shape index: {2}]   ;;  %s1982_s12 = inlined_call_operand.hbm [shape: f32[8,8,128], index: 12, kind: output, shape index: {3}]  }
   0x1   :  { %19 = vsyncpa [#allocation6], 0 }
   0x2   :  { %20 = vsyncpa [#allocation4], 0 }
   0x3   :  { %21 = vsyncpa [#allocation10], 0  ;;  %s48_s23 = sshll.u32 %s1975_s5, 4  ;;  %s49_s23 = int_to_ptr.hbm [resolvable:$true] %s48_s23 }
   0x4   :  { %22 = vsyncpa [#allocation13], 0  ;;  %s1569_s24 = smov [#allocation5]   ;;  %s31_s28 = sshll.u32 %s1972_s2, 4  ;;  %s32_s28 = int_to_ptr.hbm [resolvable:$true] %s31_s28 }
   0x5   :  { %s50_s25 = sshll.u32 %s1569_s24, 4  ;;  %s1570_s29 = smov 64   ;;  %s51_s25 = int_to_ptr.vmem [resolvable:$true] %s50_s25 }
   0x6   :  { %s1571_s30 = smov 4   ;;  %s1572_s13 = smov [#allocation2]  }
   0x7   :  { %56 = dma.hbm_to_vmem [thread:$0]  %s49_s23, 1024, %s51_s25, [#allocation6], %s1570_s29, %s1570_s29, %s1571_s30  }
   0x8   :  { %s33_s14 = sshll.u32 %s1572_s13, 4  ;;  %s1573_s15 = smov 128   ;;  %s34_s14 = int_to_ptr.vmem [resolvable:$true] %s33_s14 }
   0x9   :  { %s1574_s16 = smov 8   ;;  %s63_s18 = sshll.u32 %s1977_s7, 4  ;;  %s64_s18 = int_to_ptr.hbm [resolvable:$true] %s63_s18 }
   0xa   :  { %39 = dma.hbm_to_vmem [thread:$0]  %s32_s28, 1024, %s34_s14, [#allocation3], %s1573_s15, %s1573_s15, %s1574_s16  }
   0xb   :  { %s1575_s19 = smov [#allocation7]  }
   0xc   :  { %s65_s2 = sshll.u32 %s1575_s19, 4  ;;  %s66_s2 = int_to_ptr.vmem [resolvable:$true] %s65_s2 }
   0xd   :  { %71 = dma.hbm_to_vmem [thread:$0]  %s64_s18, 1024, %s66_s2, [#allocation6], %s1570_s29, %s1570_s29, %s1571_s30  }
   0xe   :  { %1559 = dma.done.wait [#allocation3], 1024  }
   0xf   :  { %1560 = vsyncadd [#allocation3], 4294966272 }
  0x10   :  { %1561 = dma.done.wait [#allocation6], 2048  }
  0x11   :  { %1562 = vsyncadd [#allocation6], 4294965248  ;;  %v1576_v0 = vmov 0   ;;  %v1662_v1 = vld [vmem:[%s1971_s1 + $0x10] sm:$0xff]  ;;  %v1667_v2 = vld [vmem:[%s1971_s1] sm:$0xff]  ;;  %vm95_vm0 = vcmask 64512  }
  0x12   :  { %1359 = vset.pattern.permute.xlu1 %v1576_v0  ;;  %1358 = vset.pattern.permute.xlu0 %v1576_v0  ;;  %v1674_v3 = vld [vmem:[%s1971_s1 + $0x20] sm:$0xff]  ;;  %v1336_v4 = vld [vmem:[#allocation5 + $0x38] sm:$0xff]  ;;  %v1335_v5 = vld [vmem:[#allocation5 + $0x30] sm:$0xff]  ;;  %vm372_vm1 = vcmask 1043456   ;;  %vm931_vm2 = vcmask 1041409   ;;  %vm933_vm3 = vcmask 1042434  }
  0x13   :  { %1360 = vset.pattern.permute.xlu2 %v1576_v0  ;;  %180 = vperm.xlu1 %1359, %v1662_v1   ;;  %v1680_v6 = vld [vmem:[%s1971_s1 + $0x18] sm:$0xff]  ;;  %v1685_v7 = vld [vmem:[%s1971_s1 + $0x8] sm:$0xff]  ;;  %v1703_v10 = vld [vmem:[%s1971_s1 + $0x30] sm:$0xff]  ;;  %vm935_vm4 = vcmask 1043459   ;;  %vm937_vm5 = vcmask 1044484   ;;  %vm939_vm6 = vcmask 1045509  }
  0x14   :  { %170 = vperm.xlu0 %1358, %v1667_v2   ;;  %190 = vperm.xlu2 %1360, %v1674_v3   ;;  %v1690_v8 = vld [vmem:[%s1971_s1 + $0x28] sm:$0xff]  ;;  %v1698_v9 = vld [vmem:[%s1971_s1 + $0x38] sm:$0xff]  ;;  %v1333_v12 = vld [vmem:[#allocation5 + $0x20] sm:$0xff]  ;;  %vm941_vm7 = vcmask 1046534   ;;  %vm943_vm8 = vcmask 1047559   ;;  %s1200_s19 = sshll.u32 %s1980_s10, 4  ;;  %s1201_s19 = int_to_ptr.hbm [resolvable:$true] %s1200_s19 }
  0x15   :  { %328 = vmatpush.bf16.msra.mxu0 %v1336_v4  ;;  %v1334_v11 = vld [vmem:[#allocation5 + $0x28] sm:$0xff]  ;;  %v1332_v13 = vld [vmem:[#allocation5 + $0x18] sm:$0xff]  ;;  %v1331_v14 = vld [vmem:[#allocation5 + $0x10] sm:$0xff]  ;;  %s1578_s2 = smov [#allocation9]   ;;  %s1579_s21 = smov [#allocation11]  }
  0x16   :  { %v1330_v15 = vld [vmem:[#allocation5 + $0x8] sm:$0xff]  ;;  %v1329_v16 = vld [vmem:[#allocation5] sm:$0xff]  ;;  %v1715_v22 = vld [vmem:[#allocation2 + $0x10] sm:$0xff]  ;;  %s1198_s20 = sshll.u32 %s1578_s2, 4  ;;  %s1209_s22 = sshll.u32 %s1579_s21, 4  ;;  %s1199_s20 = int_to_ptr.vmem [resolvable:$true] %s1198_s20  ;;  %s1210_s22 = int_to_ptr.vmem [resolvable:$true] %s1209_s22 }
  0x17   :  { %v1707_v17 = vld [vmem:[#allocation2] sm:$0xff]  ;;  %v1711_v19 = vld [vmem:[#allocation2 + $0x8] sm:$0xff]  ;;  %v1717_v23 = vld [vmem:[#allocation2 + $0x18] sm:$0xff]  ;;  %v102_v25 = vsel %vm95_vm0, %v1715_v22, 0.0  ;;  %s1211_s24 = sshll.u32 %s1981_s11, 4  ;;  %s1221_s26 = sshll.u32 %s1982_s12, 4  ;;  %s1212_s24 = int_to_ptr.hbm [resolvable:$true] %s1211_s24  ;;  %s1222_s26 = int_to_ptr.hbm [resolvable:$true] %s1221_s26 }
  0x18   :  { %v96_v18 = vsel %vm95_vm0, %v1707_v17, 0.0  ;;  %v99_v20 = vsel %vm95_vm0, %v1711_v19, 0.0  ;;  %v1722_v24 = vld [vmem:[%s1970_s0] sm:$0xff]  ;;  %v105_v26 = vsel %vm95_vm0, %v1717_v23, 0.0  ;;  %v1732_v28 = vld [vmem:[%s1970_s0 + $0x8] sm:$0xff]  ;;  %v1738_v37 = vld [vmem:[%s1970_s0 + $0x10] sm:$0xff] }
  0x19   :  { %329 = vmatpush.bf16.msra.mxu0 %v1335_v5  ;;  %v1743_v38 = vld [vmem:[%s1970_s0 + $0x18] sm:$0xff]  ;;  %v1745_v39 = vld [vmem:[#allocation2 + $0x20] sm:$0xff]  ;;  %v1747_v40 = vld [vmem:[#allocation2 + $0x28] sm:$0xff]  ;;  %s1580_s27 = smov [#allocation12]   ;;  %s1189_s14 = sshll.u32 %s1979_s9, 4  ;;  %s1190_s14 = int_to_ptr.hbm [resolvable:$true] %s1189_s14 }
  0x1a   :  { %v108_v42 = vsel %vm95_vm0, %v1745_v39, 0.0  ;;  %v111_v43 = vsel %vm95_vm0, %v1747_v40, 0.0  ;;  %v1758_v52 = vld [vmem:[%s1970_s0 + $0x20] sm:$0xff]  ;;  %v1763_v53 = vld [vmem:[%s1970_s0 + $0x28] sm:$0xff]  ;;  %v1765_v55 = vld [vmem:[#allocation2 + $0x30] sm:$0xff]  ;;  %s1219_s28 = sshll.u32 %s1580_s27, 4  ;;  %s1220_s28 = int_to_ptr.vmem [resolvable:$true] %s1219_s28 }
  0x1b   :  { %185 = vperm.xlu1 %1359, %v1680_v6   ;;  %v1767_v56 = vld [vmem:[#allocation2 + $0x38] sm:$0xff]  ;;  %v114_v57 = vsel %vm95_vm0, %v1765_v55, 0.0 }
  0x1c   :  { %175 = vperm.xlu0 %1358, %v1685_v7   ;;  %195 = vperm.xlu2 %1360, %v1690_v8   ;;  %v117_v58 = vsel %vm95_vm0, %v1767_v56, 0.0  ;;  %v1778_v5 = vld [vmem:[%s1970_s0 + $0x38] sm:$0xff] }
  0x1d   :  { %330 = vmatpush.bf16.msra.mxu0 %v1334_v11 }
  0x21   :  { %331 = vmatpush.bf16.msra.mxu0 %v1333_v12  ;;  %v1783_v12 = vld [vmem:[%s1970_s0 + $0x30] sm:$0xff] }
  0x23   :  { %205 = vperm.xlu1 %1359, %v1698_v9  }
  0x24   :  { %200 = vperm.xlu0 %1358, %v1703_v10  }
  0x25   :  { %332 = vmatpush.bf16.msra.mxu0 %v1332_v13 }
  0x29   :  { %333 = vmatpush.bf16.msra.mxu0 %v1331_v14 }
  0x2d   :  { %334 = vmatpush.bf16.msra.mxu0 %v1330_v15 }
  0x31   :  { %335 = vmatpush.bf16.msra.mxu0 %v1329_v16 }
  0x45   :  { %100 = vadd.xlane.f32.xlu2 %v99_v20 }
  0x4d   :  { %103 = vadd.xlane.f32.xlu1 %v102_v25  ;;  %106 = vadd.xlane.f32.xlu2 %v105_v26 }
  0x4e   :  { %97 = vadd.xlane.f32.xlu0 %v96_v18 }
  0x55   :  { %109 = vadd.xlane.f32.xlu2 %v108_v42  ;;  %118 = vadd.xlane.f32.xlu1 %v117_v58 }
  0x56   :  { %112 = vadd.xlane.f32.xlu0 %v111_v43 }
  0x5d   :  { %115 = vadd.xlane.f32.xlu2 %v114_v57 }
  0x6e   :  { %v191_v46 = vpop.permute.xlu2 %190 }
  0x6f   :  { %v212_v59 = vmul.f32 %v191_v46, %v1758_v52 }
  0x71   :  { %v236_v61 = vpack.c.bf16 %v212_v59, %v212_v59 }
  0x73   :  { %v268_v63 = vunpack.c.l.b16 %v236_v61 }
  0x76   :  { %v196_v54 = vpop.permute.xlu2 %195 }
  0x77   :  { %v213_v60 = vmul.f32 %v196_v54, %v1763_v53 }
  0x79   :  { %v237_v62 = vpack.c.bf16 %v213_v60, %v213_v60 }
  0x7b   :  { %v269_v0 = vunpack.c.l.b16 %v237_v62 }
  0x7d   :  { %v274_v4 = vpack.c.b16 %v269_v0, %v268_v63 }
  0x85   :  { %v181_v29 = vpop.permute.xlu1 %180 }
  0x86   :  { %v171_v21 = vpop.permute.xlu0 %170  ;;  %v210_v44 = vmul.f32 %v181_v29, %v1738_v37 }
  0x87   :  { %v208_v27 = vmul.f32 %v171_v21, %v1722_v24 }
  0x88   :  { %v234_v47 = vpack.c.bf16 %v210_v44, %v210_v44 }
  0x89   :  { %v232_v32 = vpack.c.bf16 %v208_v27, %v208_v27 }
  0x8a   :  { %v266_v49 = vunpack.c.l.b16 %v234_v47 }
  0x8b   :  { %v264_v34 = vunpack.c.l.b16 %v232_v32 }
  0x8d   :  { %v186_v41 = vpop.permute.xlu1 %185 }
  0x8e   :  { %v176_v30 = vpop.permute.xlu0 %175  ;;  %v211_v45 = vmul.f32 %v186_v41, %v1743_v38 }
  0x8f   :  { %v209_v31 = vmul.f32 %v176_v30, %v1732_v28 }
  0x90   :  { %v235_v48 = vpack.c.bf16 %v211_v45, %v211_v45 }
  0x91   :  { %v233_v33 = vpack.c.bf16 %v209_v31, %v209_v31 }
  0x92   :  { %v267_v50 = vunpack.c.l.b16 %v235_v48 }
  0x93   :  { %v265_v35 = vunpack.c.l.b16 %v233_v33 }
  0x94   :  { %v273_v51 = vpack.c.b16 %v267_v50, %v266_v49 }
  0x95   :  { %v272_v36 = vpack.c.b16 %v265_v35, %v264_v34  ;;  %v206_v11 = vpop.permute.xlu1 %205 }
  0x96   :  { %v201_v13 = vpop.permute.xlu0 %200  ;;  %v215_v14 = vmul.f32 %v206_v11, %v1778_v5 }
  0x97   :  { %336 = vmatmul.bf16.vlgmr.msra.gmra.mxu0 %v272_v36  ;;  %v214_v15 = vmul.f32 %v201_v13, %v1783_v12 }
  0x98   :  { %v239_v18 = vpack.c.bf16 %v215_v14, %v215_v14 }
  0x99   :  { %v238_v16 = vpack.c.bf16 %v214_v15, %v214_v15 }
  0x9a   :  { %v271_v21 = vunpack.c.l.b16 %v239_v18 }
  0x9b   :  { %v270_v20 = vunpack.c.l.b16 %v238_v16 }
  0x9d   :  { %v275_v25 = vpack.c.b16 %v271_v21, %v270_v20 }
  0xa7   :  { %341 = vmatmul.bf16.gmra.mxu0 %v273_v51 }
  0xb7   :  { %346 = vmatmul.bf16.gmra.mxu0 %v274_v4 }
  0xb8   :  { %v101_v29 = vpop.xlane.xlu2 %100 }
  0xb9   :  { %v121_v30 = vadd.f32 1.0, %v101_v29 }
  0xc0   :  { %v104_v32 = vpop.xlane.xlu1 %103  ;;  %v107_v44 = vpop.xlane.xlu2 %106 }
  0xc1   :  { %v98_v26 = vpop.xlane.xlu0 %97  ;;  %v122_v36 = vadd.f32 1.0, %v104_v32 }
  0xc2   :  { %v120_v27 = vadd.f32 1.0, %v98_v26 }
  0xc4   :  { %1369 = vrcp.f32 %v120_v27 }
  0xc5   :  { %1371 = vrcp.f32 %v121_v30 }
  0xc6   :  { %1373 = vrcp.f32 %v122_v36 }
  0xc7   :  { %351 = vmatmul.bf16.gmra.mxu0 %v275_v25 }
  0xc8   :  { %v110_v54 = vpop.xlane.xlu2 %109  ;;  %v119_v29 = vpop.xlane.xlu1 %118 }
  0xc9   :  { %v124_v59 = vadd.f32 1.0, %v110_v54  ;;  %v113_v63 = vpop.xlane.xlu0 %112  ;;  %v127_v32 = vadd.f32 1.0, %v119_v29  ;;  %v1341_v54 = vld [vmem:[#allocation7 + $0x20] sm:$0xff] }
  0xca   :  { %v1370_v31 = vpop.eup %1369 }
  0xcb   :  { %v136_v33 = vmul.f32 %v1370_v31, %v1707_v17  ;;  %v1372_v43 = vpop.eup %1371  ;;  %v123_v17 = vadd.f32 1.0, %v107_v44 }
  0xcc   :  { %v137_v45 = vmul.f32 %v1372_v43, %v1711_v19  ;;  %v1374_v50 = vpop.eup %1373 }
  0xcd   :  { %v1789_v42 = vpack.c.bf16 %v136_v33, %v136_v33  ;;  %1375 = vrcp.f32 %v123_v17  ;;  %v138_v51 = vmul.f32 %v1374_v50, %v1715_v22  ;;  %v125_v22 = vadd.f32 1.0, %v113_v63  ;;  %v1343_v50 = vld [vmem:[#allocation7 + $0x30] sm:$0xff] }
  0xce   :  { %v1795_v49 = vpack.c.bf16 %v137_v45, %v137_v45  ;;  %1377 = vrcp.f32 %v124_v59  ;;  %v1337_v59 = vld [vmem:[#allocation7] sm:$0xff] }
  0xcf   :  { %v1801_v60 = vpack.c.bf16 %v138_v51, %v138_v51  ;;  %1379 = vrcp.f32 %v125_v22  ;;  %v1342_v51 = vld [vmem:[#allocation7 + $0x28] sm:$0xff] }
  0xd0   :  { %v116_v16 = vpop.xlane.xlu2 %115 }
  0xd3   :  { %v1376_v61 = vpop.eup %1375 }
  0xd4   :  { %v139_v62 = vmul.f32 %v1376_v61, %v1717_v23  ;;  %v1378_v14 = vpop.eup %1377  ;;  %v126_v23 = vadd.f32 1.0, %v116_v16  ;;  %v1367_v61 = vld [vmem:[%s1976_s6] ss:$0 sm:$0xff] }
  0xd5   :  { %v140_v15 = vmul.f32 %v1378_v14, %v1745_v39  ;;  %v1380_v26 = vpop.eup %1379  ;;  %v1344_v39 = vld [vmem:[#allocation7 + $0x38] sm:$0xff] }
  0xd6   :  { %v1807_v13 = vpack.c.bf16 %v139_v62, %v139_v62  ;;  %1381 = vrcp.f32 %v126_v23  ;;  %v141_v27 = vmul.f32 %v1380_v26, %v1747_v40 }
  0xd7   :  { %v1813_v25 = vpack.c.bf16 %v140_v15, %v140_v15  ;;  %1383 = vrcp.f32 %v127_v32 }
 0x114   :  { %v337_v34 = vpop.f32.mrf.mxu0 }
 0x115   :  { %v357_v35 = vpack.c.bf16 %v337_v34, %v337_v34  ;;  %v1819_v34 = vpack.c.bf16 %v141_v27, %v141_v27 }
 0x117   :  { %v374_v41 = vsel %vm372_vm1, %v357_v35, 0  ;;  %v1382_v35 = vpop.eup %1381 }
 0x118   :  { %383 = vmatpush.bf16.msra.mxu1 %v374_v41  ;;  %v142_v36 = vmul.f32 %v1382_v35, %v1765_v55  ;;  %v1384_v45 = vpop.eup %1383 }
 0x11a   :  { %v1824_v43 = vpack.c.bf16 %v142_v36, %v142_v36 }
 0x11b   :  { %1281 = vmatmul.msk.bf16.vlgmr.msra.gmra.mxu1 %vm95_vm0, %v1789_v42 }
 0x11c   :  { %v339_v46 = vpop.f32.mrf.mxu0 }
 0x11d   :  { %v358_v47 = vpack.c.bf16 %v339_v46, %v339_v46  ;;  %v143_v46 = vmul.f32 %v1384_v45, %v1767_v56  ;;  %v1340_v56 = vld [vmem:[#allocation7 + $0x18] sm:$0xff] }
 0x11f   :  { %v393_v48 = vsel %vm372_vm1, %v358_v47, 0 }
 0x120   :  { %402 = vmatpush.bf16.msra.mxu2 %v393_v48  ;;  %v1830_v48 = vpack.c.bf16 %v143_v46, %v143_v46 }
 0x123   :  { %1282 = vmatmul.msk.bf16.vlgmr.msra.gmra.mxu2 %vm95_vm0, %v1795_v49 }
 0x124   :  { %v342_v57 = vpop.f32.mrf.mxu0 }
 0x125   :  { %v359_v58 = vpack.c.bf16 %v342_v57, %v342_v57  ;;  %v1339_v57 = vld [vmem:[#allocation7 + $0x10] sm:$0xff] }
 0x127   :  { %v412_v19 = vsel %vm372_vm1, %v359_v58, 0  ;;  %v1338_v58 = vld [vmem:[#allocation7 + $0x8] sm:$0xff] }
 0x128   :  { %421 = vmatpush.bf16.msra.mxu3 %v412_v19 }
 0x12b   :  { %1283 = vmatmul.msk.bf16.vlgmr.msra.gmra.mxu3 %vm95_vm0, %v1801_v60 }
 0x12c   :  { %v344_v0 = vpop.f32.mrf.mxu0 }
 0x12d   :  { %v360_v4 = vpack.c.bf16 %v344_v0, %v344_v0 }
 0x12f   :  { %v431_v11 = vsel %vm372_vm1, %v360_v4, 0 }
 0x130   :  { %440 = vmatpush.bf16.msrb.mxu1 %v431_v11 }
 0x133   :  { %1284 = vmatmul.msk.bf16.vlgmr.msrb.gmra.mxu1 %vm95_vm0, %v1807_v13 }
 0x134   :  { %v347_v18 = vpop.f32.mrf.mxu0 }
 0x135   :  { %v361_v20 = vpack.c.bf16 %v347_v18, %v347_v18 }
 0x137   :  { %v450_v21 = vsel %vm372_vm1, %v361_v20, 0 }
 0x138   :  { %459 = vmatpush.bf16.msrb.mxu2 %v450_v21 }
 0x13b   :  { %1285 = vmatmul.msk.bf16.vlgmr.msrb.gmra.mxu2 %vm95_vm0, %v1813_v25 }
 0x13c   :  { %v349_v30 = vpop.f32.mrf.mxu0 }
 0x13d   :  { %v362_v31 = vpack.c.bf16 %v349_v30, %v349_v30 }
 0x13f   :  { %v469_v33 = vsel %vm372_vm1, %v362_v31, 0 }
 0x140   :  { %478 = vmatpush.bf16.msrb.mxu3 %v469_v33 }
 0x143   :  { %1286 = vmatmul.msk.bf16.vlgmr.msrb.gmra.mxu3 %vm95_vm0, %v1819_v34 }
 0x144   :  { %642 = vmatpush.bf16.msra.mxu3 %v1344_v39  ;;  %v352_v41 = vpop.f32.mrf.mxu0 }
 0x145   :  { %v363_v40 = vpack.c.bf16 %v352_v41, %v352_v41 }
 0x147   :  { %v488_v44 = vsel %vm372_vm1, %v363_v40, 0 }
 0x148   :  { %497 = vmatpush.bf16.msra.mxu1 %v488_v44  ;;  %643 = vmatpush.bf16.msra.mxu3 %v1343_v50 }
 0x14b   :  { %1287 = vmatmul.msk.bf16.vlgmr.msra.gmra.mxu1 %vm95_vm0, %v1824_v43 }
 0x14c   :  { %v354_v47 = vpop.f32.mrf.mxu0  ;;  %644 = vmatpush.bf16.msra.mxu3 %v1342_v51 }
 0x14d   :  { %v364_v17 = vpack.c.bf16 %v354_v47, %v354_v47 }
 0x14f   :  { %v507_v55 = vsel %vm372_vm1, %v364_v17, 0 }
 0x150   :  { %516 = vmatpush.bf16.msra.mxu2 %v507_v55  ;;  %645 = vmatpush.bf16.msra.mxu3 %v1341_v54 }
 0x153   :  { %1288 = vmatmul.msk.bf16.vlgmr.msra.gmra.mxu2 %vm95_vm0, %v1830_v48 }
 0x154   :  { %646 = vmatpush.bf16.msra.mxu3 %v1340_v56 }
 0x158   :  { %647 = vmatpush.bf16.msra.mxu3 %v1339_v57 }
 0x15c   :  { %648 = vmatpush.bf16.msra.mxu3 %v1338_v58 }
 0x160   :  { %649 = vmatpush.bf16.msra.mxu3 %v1337_v59 }
 0x198   :  { %v385_v19 = vpop.f32.mrf.mxu1 }
 0x199   :  { %v386_v62 = vadd.f32 %v1367_v61, %v385_v19 }
 0x19b   :  { %v522_v0 = vmax.f32 %v386_v62, 0.0 }
 0x19d   :  { %v546_v11 = vpack.c.bf16 %v522_v0, %v522_v0 }
 0x19f   :  { %v578_v16 = vunpack.c.l.b16 %v546_v11 }
 0x1a0   :  { %v387_v63 = vpop.f32.mrf.mxu1 }
 0x1a6   :  { %v404_v4 = vpop.f32.mrf.mxu2 }
 0x1a7   :  { %v405_v22 = vadd.f32 %v1367_v61, %v404_v4 }
 0x1a9   :  { %v523_v14 = vmax.f32 %v405_v22, 0.0 }
 0x1ab   :  { %v547_v15 = vpack.c.bf16 %v523_v14, %v523_v14 }
 0x1ad   :  { %v579_v18 = vunpack.c.l.b16 %v547_v15 }
 0x1ae   :  { %v406_v20 = vpop.f32.mrf.mxu2  ;;  %v423_v23 = vpop.f32.mrf.mxu3 }
 0x1af   :  { %v424_v21 = vadd.f32 %v1367_v61, %v423_v23  ;;  %v586_v26 = vpack.c.b16 %v579_v18, %v578_v16 }
 0x1b0   :  { %v442_v27 = vpop.f32.mrf.mxu1 }
 0x1b1   :  { %v524_v29 = vmax.f32 %v424_v21, 0.0  ;;  %v443_v30 = vadd.f32 %v1367_v61, %v442_v27  ;;  %650 = vmatmul.bf16.vlgmr.msra.gmra.mxu3 %v586_v26  ;;  %v1577_v21 = vmov 1  }
 0x1b2   :  { %1361 = vset.pattern.permute.xlu0 %v1577_v21  ;;  %1362 = vset.pattern.permute.xlu1 %v1577_v21 }
 0x1b3   :  { %v525_v31 = vmax.f32 %v443_v30, 0.0  ;;  %v548_v39 = vpack.c.bf16 %v524_v29, %v524_v29  ;;  %836 = vperm.xlu0 %1361, %v1667_v2   ;;  %840 = vperm.xlu1 %1362, %v1685_v7  }
 0x1b4   :  { %1363 = vset.pattern.permute.xlu2 %v1577_v21 }
 0x1b5   :  { %v549_v32 = vpack.c.bf16 %v525_v31, %v525_v31  ;;  %v580_v36 = vunpack.c.l.b16 %v548_v39  ;;  %844 = vperm.xlu2 %1363, %v1662_v1  }
 0x1b6   :  { %v425_v33 = vpop.f32.mrf.mxu3 }
 0x1b7   :  { %v581_v41 = vunpack.c.l.b16 %v549_v32 }
 0x1b8   :  { %v444_v35 = vpop.f32.mrf.mxu1 }
 0x1b9   :  { %v587_v40 = vpack.c.b16 %v581_v41, %v580_v36 }
 0x1bb   :  { %848 = vperm.xlu1 %1362, %v1680_v6   ;;  %864 = vperm.xlu0 %1361, %v1698_v9  }
 0x1bd   :  { %852 = vperm.xlu2 %1363, %v1674_v3  }
 0x1be   :  { %v461_v44 = vpop.f32.mrf.mxu2 }
 0x1bf   :  { %v462_v45 = vadd.f32 %v1367_v61, %v461_v44 }
 0x1c1   :  { %655 = vmatmul.bf16.gmra.mxu3 %v587_v40  ;;  %v526_v46 = vmax.f32 %v462_v45, 0.0 }
 0x1c3   :  { %v550_v50 = vpack.c.bf16 %v526_v46, %v526_v46  ;;  %856 = vperm.xlu1 %1362, %v1690_v8  }
 0x1c5   :  { %v582_v57 = vunpack.c.l.b16 %v550_v50  ;;  %860 = vperm.xlu2 %1363, %v1703_v10  }
 0x1c6   :  { %v463_v47 = vpop.f32.mrf.mxu2  ;;  %v480_v17 = vpop.f32.mrf.mxu3 }
 0x1c7   :  { %v481_v55 = vadd.f32 %v1367_v61, %v480_v17 }
 0x1c8   :  { %v499_v51 = vpop.f32.mrf.mxu1 }
 0x1c9   :  { %v527_v54 = vmax.f32 %v481_v55, 0.0  ;;  %v500_v19 = vadd.f32 %v1367_v61, %v499_v51 }
 0x1cb   :  { %v551_v56 = vpack.c.bf16 %v527_v54, %v527_v54  ;;  %v528_v0 = vmax.f32 %v500_v19, 0.0 }
 0x1cd   :  { %v583_v58 = vunpack.c.l.b16 %v551_v56  ;;  %v552_v11 = vpack.c.bf16 %v528_v0, %v528_v0 }
 0x1ce   :  { %v482_v59 = vpop.f32.mrf.mxu3 }
 0x1cf   :  { %v588_v62 = vpack.c.b16 %v583_v58, %v582_v57  ;;  %v584_v16 = vunpack.c.l.b16 %v552_v11  ;;  %v1880_v58 = vld [vmem:[%s1974_s4] sm:$0xff] }
 0x1d0   :  { %v501_v63 = vpop.f32.mrf.mxu1 }
 0x1d1   :  { %660 = vmatmul.bf16.gmra.mxu3 %v588_v62 }
 0x1d6   :  { %v518_v4 = vpop.f32.mrf.mxu2 }
 0x1d7   :  { %v519_v22 = vadd.f32 %v1367_v61, %v518_v4 }
 0x1d9   :  { %v529_v14 = vmax.f32 %v519_v22, 0.0 }
 0x1db   :  { %v553_v15 = vpack.c.bf16 %v529_v14, %v529_v14 }
 0x1dd   :  { %v585_v18 = vunpack.c.l.b16 %v553_v15 }
 0x1de   :  { %v520_v20 = vpop.f32.mrf.mxu2 }
 0x1df   :  { %v589_v23 = vpack.c.b16 %v585_v18, %v584_v16 }
 0x1e1   :  { %665 = vmatmul.bf16.gmra.mxu3 %v589_v23 }
 0x20f   :  { %v845_v63 = vpop.permute.xlu2 %844 }
 0x225   :  { %v837_v44 = vpop.permute.xlu0 %836  ;;  %v841_v57 = vpop.permute.xlu1 %840 }
 0x234   :  { %v651_v61 = vpop.f32.mrf.mxu3 }
 0x235   :  { %v671_v26 = vpack.c.bf16 %v651_v61, %v651_v61 }
 0x237   :  { %v684_v27 = vsel %vm372_vm1, %v671_v26, 0 }
 0x238   :  { %693 = vmatpush.bf16.msrb.mxu1 %v684_v27 }
 0x23b   :  { %1321 = vmatmul.msk.bf16.vlgmr.msrb.gmra.mxu1 %vm95_vm0, %v1789_v42 }
 0x23c   :  { %v653_v2 = vpop.f32.mrf.mxu3 }
 0x23d   :  { %v672_v1 = vpack.c.bf16 %v653_v2, %v653_v2 }
 0x23f   :  { %v700_v6 = vsel %vm372_vm1, %v672_v1, 0 }
 0x240   :  { %709 = vmatpush.bf16.msrb.mxu2 %v700_v6 }
 0x243   :  { %1322 = vmatmul.msk.bf16.vlgmr.msrb.gmra.mxu2 %vm95_vm0, %v1795_v49 }
 0x244   :  { %v656_v3 = vpop.f32.mrf.mxu3 }
 0x245   :  { %v673_v7 = vpack.c.bf16 %v656_v3, %v656_v3  ;;  %v957_v3 = vrot.slane %v1880_v58, 1 }
 0x247   :  { %v716_v9 = vsel %vm372_vm1, %v673_v7, 0 }
 0x248   :  { %725 = vmatpush.bf16.msra.mxu1 %v716_v9 }
 0x24b   :  { %1323 = vmatmul.msk.bf16.vlgmr.msra.gmra.mxu1 %vm95_vm0, %v1801_v60 }
 0x24c   :  { %v658_v8 = vpop.f32.mrf.mxu3 }
 0x24d   :  { %v674_v42 = vpack.c.bf16 %v658_v8, %v658_v8 }
 0x24f   :  { %v732_v29 = vsel %vm372_vm1, %v674_v42, 0 }
 0x250   :  { %741 = vmatpush.bf16.msra.mxu2 %v732_v29  ;;  %v958_v29 = vrot.slane %v1880_v58, 2 }
 0x253   :  { %1324 = vmatmul.msk.bf16.vlgmr.msra.gmra.mxu2 %vm95_vm0, %v1807_v13 }
 0x254   :  { %v661_v10 = vpop.f32.mrf.mxu3 }
 0x255   :  { %v675_v30 = vpack.c.bf16 %v661_v10, %v661_v10 }
 0x257   :  { %v748_v49 = vsel %vm372_vm1, %v675_v30, 0 }
 0x258   :  { %757 = vmatpush.bf16.msrb.mxu1 %v748_v49 }
 0x25b   :  { %1325 = vmatmul.msk.bf16.vlgmr.msrb.gmra.mxu1 %vm95_vm0, %v1813_v25 }
 0x25c   :  { %v663_v31 = vpop.f32.mrf.mxu3 }
 0x25d   :  { %v676_v39 = vpack.c.bf16 %v663_v31, %v663_v31 }
 0x25f   :  { %v764_v60 = vsel %vm372_vm1, %v676_v39, 0 }
 0x260   :  { %773 = vmatpush.bf16.msrb.mxu2 %v764_v60  ;;  %v853_v60 = vpop.permute.xlu2 %852 }
 0x263   :  { %1326 = vmatmul.msk.bf16.vlgmr.msrb.gmra.mxu2 %vm95_vm0, %v1819_v34  ;;  %v1873_v34 = vld [vmem:[%s1978_s8] ss:$0 sm:$0xff] }
 0x264   :  { %v666_v32 = vpop.f32.mrf.mxu3 }
 0x265   :  { %v677_v33 = vpack.c.bf16 %v666_v32, %v666_v32 }
 0x267   :  { %v780_v13 = vsel %vm372_vm1, %v677_v33, 0 }
 0x268   :  { %789 = vmatpush.bf16.msrb.mxu0 %v780_v13 }
 0x26b   :  { %1327 = vmatmul.msk.bf16.vlgmr.msrb.gmra.mxu0 %vm95_vm0, %v1824_v43 }
 0x26c   :  { %v668_v35 = vpop.f32.mrf.mxu3 }
 0x26d   :  { %v678_v36 = vpack.c.bf16 %v668_v35, %v668_v35 }
 0x26f   :  { %v796_v25 = vsel %vm372_vm1, %v678_v36, 0 }
 0x270   :  { %805 = vmatpush.bf16.msra.mxu1 %v796_v25 }
 0x273   :  { %1328 = vmatmul.msk.bf16.vlgmr.msra.gmra.mxu1 %vm95_vm0, %v1830_v48 }
 0x2b8   :  { %v695_v41 = vpop.f32.mrf.mxu1 }
 0x2b9   :  { %v696_v40 = vadd.f32 %v1873_v34, %v695_v41 }
 0x2bb   :  { %v811_v45 = vmax.f32 %v696_v40, 0.0 }
 0x2bd   :  { %819 = vst [vmem:[#allocation12] sm:$0xff] %v811_v45  ;;  %v867_v43 = vmul.f32 %v837_v44, %v811_v45 }
 0x2bf   :  { %v875_v46 = vrot.slane %v867_v43, 4 }
 0x2c0   :  { %v697_v47 = vpop.f32.mrf.mxu1 }
 0x2c1   :  { %v876_v17 = vadd.f32 %v875_v46, %v867_v43 }
 0x2c3   :  { %v877_v55 = vrot.slane %v876_v17, 2 }
 0x2c5   :  { %v878_v50 = vadd.f32 %v877_v55, %v876_v17 }
 0x2c6   :  { %v711_v51 = vpop.f32.mrf.mxu2 }
 0x2c7   :  { %v879_v54 = vrot.slane %v878_v50, 1  ;;  %v712_v48 = vadd.f32 %v1873_v34, %v711_v51 }
 0x2c8   :  { %v727_v56 = vpop.f32.mrf.mxu1 }
 0x2c9   :  { %v812_v59 = vmax.f32 %v712_v48, 0.0  ;;  %v728_v19 = vadd.f32 %v1873_v34, %v727_v56  ;;  %v1883_v62 = vadd.f32 %v879_v54, %v878_v50  ;;  %v959_v56 = vrot.slane %v1880_v58, 3 }
 0x2cb   :  { %820 = vst [vmem:[#allocation12 + $0x8] sm:$0xff] %v812_v59  ;;  %v813_v0 = vmax.f32 %v728_v19, 0.0  ;;  %v868_v4 = vmul.f32 %v841_v57, %v812_v59  ;;  %v972_v22 = vadd.f32 %v1880_v58, %v1883_v62 }
 0x2cd   :  { %821 = vst [vmem:[#allocation12 + $0x10] sm:$0xff] %v813_v0  ;;  %v881_v11 = vrot.slane %v868_v4, 4  ;;  %v869_v14 = vmul.f32 %v845_v63, %v813_v0  ;;  %v980_v15 = vperm.slane %v972_v22, 0  ;;  %v960_v63 = vrot.slane %v1880_v58, 4 }
 0x2ce   :  { %v713_v16 = vpop.f32.mrf.mxu2 }
 0x2cf   :  { %v882_v18 = vadd.f32 %v881_v11, %v868_v4  ;;  %v887_v20 = vrot.slane %v869_v14, 4  ;;  %v988_v23 = vmul.f32 %v980_v15, %v1722_v24  ;;  %v849_v24 = vpop.permute.xlu1 %848 }
 0x2d0   :  { %v729_v21 = vpop.f32.mrf.mxu1 }
 0x2d1   :  { %v883_v61 = vrot.slane %v882_v18, 2  ;;  %v888_v26 = vadd.f32 %v887_v20, %v869_v14  ;;  %996 = vadd.xlane.f32.xlu1 %v988_v23  ;;  %v861_v21 = vpop.permute.xlu2 %860 }
 0x2d3   :  { %v884_v27 = vadd.f32 %v883_v61, %v882_v18  ;;  %v889_v2 = vrot.slane %v888_v26, 2 }
 0x2d5   :  { %v885_v1 = vrot.slane %v884_v27, 1  ;;  %v890_v6 = vadd.f32 %v889_v2, %v888_v26 }
 0x2d6   :  { %v743_v7 = vpop.f32.mrf.mxu2 }
 0x2d7   :  { %v891_v9 = vrot.slane %v890_v6, 1  ;;  %v744_v8 = vadd.f32 %v1873_v34, %v743_v7  ;;  %v1890_v42 = vadd.f32 %v885_v1, %v884_v27  ;;  %v857_v15 = vpop.permute.xlu1 %856 }
 0x2d8   :  { %v759_v10 = vpop.f32.mrf.mxu1 }
 0x2d9   :  { %v814_v30 = vmax.f32 %v744_v8, 0.0  ;;  %v760_v49 = vadd.f32 %v1873_v34, %v759_v10  ;;  %v973_v31 = vadd.f32 %v957_v3, %v1890_v42  ;;  %v1895_v39 = vadd.f32 %v891_v9, %v890_v6 }
 0x2db   :  { %822 = vst [vmem:[#allocation12 + $0x18] sm:$0xff] %v814_v30  ;;  %v815_v32 = vmax.f32 %v760_v49, 0.0  ;;  %v870_v33 = vmul.f32 %v849_v24, %v814_v30  ;;  %v981_v13 = vperm.slane %v973_v31, 0  ;;  %v974_v35 = vadd.f32 %v958_v29, %v1895_v39 }
 0x2dd   :  { %823 = vst [vmem:[#allocation12 + $0x20] sm:$0xff] %v815_v32  ;;  %v893_v36 = vrot.slane %v870_v33, 4  ;;  %v871_v25 = vmul.f32 %v853_v60, %v815_v32  ;;  %v989_v41 = vmul.f32 %v981_v13, %v1732_v28  ;;  %v982_v40 = vperm.slane %v974_v35, 0  ;;  %v865_v60 = vpop.permute.xlu0 %864 }
 0x2de   :  { %v745_v44 = vpop.f32.mrf.mxu2  ;;  %v961_v35 = vrot.slane %v1880_v58, 5 }
 0x2df   :  { %v894_v45 = vadd.f32 %v893_v36, %v870_v33  ;;  %v899_v43 = vrot.slane %v871_v25, 4  ;;  %998 = vadd.xlane.f32.xlu2 %v989_v41  ;;  %v990_v46 = vmul.f32 %v982_v40, %v1738_v37  ;;  %v962_v36 = vrot.slane %v1880_v58, 6 }
 0x2e0   :  { %v761_v47 = vpop.f32.mrf.mxu1  ;;  %v932_v40 = vsel %vm931_vm2, %v1890_v42, %v1883_v62 }
 0x2e1   :  { %v895_v17 = vrot.slane %v894_v45, 2  ;;  %v900_v55 = vadd.f32 %v899_v43, %v871_v25  ;;  %1000 = vadd.xlane.f32.xlu0 %v990_v46  ;;  %v934_v47 = vsel %vm933_vm3, %v1895_v39, %v932_v40  ;;  %v963_v39 = vrot.slane %v1880_v58, 7 }
 0x2e3   :  { %v896_v50 = vadd.f32 %v895_v17, %v894_v45  ;;  %v901_v51 = vrot.slane %v900_v55, 2 }
 0x2e5   :  { %v897_v54 = vrot.slane %v896_v50, 1  ;;  %v902_v48 = vadd.f32 %v901_v51, %v900_v55 }
 0x2e6   :  { %v775_v57 = vpop.f32.mrf.mxu2 }
 0x2e7   :  { %v903_v59 = vrot.slane %v902_v48, 1  ;;  %v776_v28 = vadd.f32 %v1873_v34, %v775_v57  ;;  %v898_v19 = vadd.f32 %v897_v54, %v896_v50 }
 0x2e8   :  { %v791_v0 = vpop.f32.mrf.mxu0 }
 0x2e9   :  { %v816_v4 = vmax.f32 %v776_v28, 0.0  ;;  %v792_v22 = vadd.f32 %v1873_v34, %v791_v0  ;;  %v975_v11 = vadd.f32 %v959_v56, %v898_v19  ;;  %v904_v14 = vadd.f32 %v903_v59, %v902_v48 }
 0x2ea   :  { %v936_v51 = vsel %vm935_vm4, %v898_v19, %v934_v47 }
 0x2eb   :  { %824 = vst [vmem:[#allocation12 + $0x28] sm:$0xff] %v816_v4  ;;  %v817_v16 = vmax.f32 %v792_v22, 0.0  ;;  %v872_v18 = vmul.f32 %v857_v15, %v816_v4  ;;  %v983_v20 = vperm.slane %v975_v11, 0  ;;  %v976_v23 = vadd.f32 %v960_v63, %v904_v14 }
 0x2ec   :  { %v938_v62 = vsel %vm937_vm5, %v904_v14, %v936_v51  ;;  %v1022_v14 = vlaneseq }
 0x2ed   :  { %825 = vst [vmem:[#allocation12 + $0x30] sm:$0xff] %v817_v16  ;;  %v905_v61 = vrot.slane %v872_v18, 4  ;;  %v873_v26 = vmul.f32 %v861_v21, %v817_v16  ;;  %v991_v27 = vmul.f32 %v983_v20, %v1743_v38  ;;  %v984_v2 = vperm.slane %v976_v23, 0 }
 0x2ee   :  { %v777_v1 = vpop.f32.mrf.mxu2  ;;  %v1023_v58 = vand.u32 127, %v1022_v14 }
 0x2ef   :  { %v906_v6 = vadd.f32 %v905_v61, %v872_v18  ;;  %v911_v3 = vrot.slane %v873_v26, 4  ;;  %1002 = vadd.xlane.f32.xlu1 %v991_v27  ;;  %v992_v7 = vmul.f32 %v984_v2, %v1758_v52 }
 0x2f0   :  { %v793_v9 = vpop.f32.mrf.mxu0  ;;  %v807_v8 = vpop.f32.mrf.mxu1 }
 0x2f1   :  { %v808_v29 = vadd.f32 %v1873_v34, %v807_v8  ;;  %v907_v10 = vrot.slane %v906_v6, 2  ;;  %v912_v24 = vadd.f32 %v911_v3, %v873_v26  ;;  %1004 = vadd.xlane.f32.xlu2 %v992_v7 }
 0x2f3   :  { %v818_v30 = vmax.f32 %v808_v29, 0.0  ;;  %v908_v49 = vadd.f32 %v907_v10, %v906_v6  ;;  %v913_v31 = vrot.slane %v912_v24, 2  ;;  %v1012_v10 = vld [vmem:[%s1973_s3] sm:$0xff] }
 0x2f4   :  { %vm1013_vm9 = vcmp.eq.f32.partialorder %v1012_v10, 0.0 }
 0x2f5   :  { %826 = vst [vmem:[#allocation12 + $0x38] sm:$0xff] %v818_v30  ;;  %v909_v32 = vrot.slane %v908_v49, 1  ;;  %v914_v33 = vadd.f32 %v913_v31, %v912_v24  ;;  %v874_v13 = vmul.f32 %v865_v60, %v818_v30 }
 0x2f6   :  { %1227 = dma.vmem_to_hbm [thread:$0]  %s1220_s28, 1024, %s1222_s26, [#allocation13], %s1573_s15, %s1573_s15, %s1574_s16  }
 0x2f7   :  { %v915_v25 = vrot.slane %v914_v33, 1  ;;  %v917_v41 = vrot.slane %v874_v13, 4  ;;  %v910_v34 = vadd.f32 %v909_v32, %v908_v49 }
 0x2f8   :  { %v809_v44 = vpop.f32.mrf.mxu1 }
 0x2f9   :  { %v918_v45 = vadd.f32 %v917_v41, %v874_v13  ;;  %v977_v43 = vadd.f32 %v961_v35, %v910_v34  ;;  %v916_v46 = vadd.f32 %v915_v25, %v914_v33  ;;  %v940_v59 = vsel %vm939_vm6, %v910_v34, %v938_v62 }
 0x2fa   :  { %v1055_v34 = vshrl.u32 %v1022_v14, 7 }
 0x2fb   :  { %v919_v17 = vrot.slane %v918_v45, 2  ;;  %v985_v55 = vperm.slane %v977_v43, 0  ;;  %v978_v50 = vadd.f32 %v962_v36, %v916_v46  ;;  %v942_v19 = vsel %vm941_vm7, %v916_v46, %v940_v59 }
 0x2fc   :  { %1366 = vset.pattern.permute.xlu1 %v1055_v34  ;;  %1364 = vset.pattern.permute.xlu2 %v1055_v34 }
 0x2fd   :  { %v920_v54 = vadd.f32 %v919_v17, %v918_v45  ;;  %v993_v48 = vmul.f32 %v985_v55, %v1763_v53  ;;  %v986_v56 = vperm.slane %v978_v50, 0  ;;  %1365 = vset.pattern.permute.xlu0 %v1055_v34 }
 0x2ff   :  { %v921_v42 = vrot.slane %v920_v54, 1  ;;  %1006 = vadd.xlane.f32.xlu0 %v993_v48  ;;  %v994_v57 = vmul.f32 %v986_v56, %v1783_v12 }
 0x301   :  { %1008 = vadd.xlane.f32.xlu1 %v994_v57  ;;  %v922_v28 = vadd.f32 %v921_v42, %v920_v54  ;;  %v1389_v42 = vld [vmem:[%s1970_s0] sm:$0xff] }
 0x303   :  { %v979_v63 = vadd.f32 %v963_v39, %v922_v28  ;;  %v944_v0 = vsel %vm943_vm8, %v922_v28, %v942_v19 }
 0x304   :  { %946 = vst [vmem:[#allocation11] sm:$0xff] %v944_v0  ;;  %v1390_v0 = vld [vmem:[%s1970_s0 + $0x8] sm:$0xff]  ;;  %s1581_s0 = smov [#allocation8]  }
 0x305   :  { %v987_v4 = vperm.slane %v979_v63, 0  ;;  %s1187_s15 = sshll.u32 %s1581_s0, 4  ;;  %s1188_s15 = int_to_ptr.vmem [resolvable:$true] %s1187_s15 }
 0x307   :  { %v995_v22 = vmul.f32 %v987_v4, %v1778_v5 }
 0x309   :  { %1010 = vadd.xlane.f32.xlu2 %v995_v22 }
 0x344   :  { %v997_v11 = vpop.xlane.xlu1 %996 }
 0x345   :  { %v1024_v23 = vperm.slane %v997_v11, %v1023_v58 }
 0x352   :  { %v999_v15 = vpop.xlane.xlu2 %998 }
 0x353   :  { %v1025_v18 = vperm.slane %v999_v15, %v1023_v58 }
 0x354   :  { %v1001_v16 = vpop.xlane.xlu0 %1000 }
 0x355   :  { %v1026_v21 = vperm.slane %v1001_v16, %v1023_v58  ;;  %v1032_v61 = vsel %vm931_vm2, %v1025_v18, %v1024_v23 }
 0x357   :  { %v1033_v1 = vsel %vm933_vm3, %v1026_v21, %v1032_v61 }
 0x362   :  { %v1003_v20 = vpop.xlane.xlu1 %1002 }
 0x363   :  { %v1027_v26 = vperm.slane %v1003_v20, %v1023_v58 }
 0x364   :  { %v1005_v27 = vpop.xlane.xlu2 %1004 }
 0x365   :  { %v1028_v6 = vperm.slane %v1005_v27, %v1023_v58  ;;  %v1034_v3 = vsel %vm935_vm4, %v1027_v26, %v1033_v1 }
 0x367   :  { %v1035_v8 = vsel %vm937_vm5, %v1028_v6, %v1034_v3 }
 0x372   :  { %v1007_v2 = vpop.xlane.xlu0 %1006 }
 0x373   :  { %v1029_v7 = vperm.slane %v1007_v2, %v1023_v58 }
 0x374   :  { %v1009_v9 = vpop.xlane.xlu1 %1008 }
 0x375   :  { %v1030_v29 = vperm.slane %v1009_v9, %v1023_v58  ;;  %v1036_v24 = vsel %vm939_vm6, %v1029_v7, %v1035_v8 }
 0x377   :  { %v1037_v31 = vsel %vm941_vm7, %v1030_v29, %v1036_v24 }
 0x37c   :  { %v1011_v30 = vpop.xlane.xlu2 %1010 }
 0x37d   :  { %v1031_v49 = vperm.slane %v1011_v30, %v1023_v58 }
 0x37f   :  { %v1038_v60 = vsel %vm943_vm8, %v1031_v49, %v1037_v31 }
 0x380   :  { %v1040_v32 = vsel %vm1013_vm9, -1e+09, %v1038_v60 }
 0x381   :  { %v1041_v33 = vsel %vm95_vm0, %v1040_v32, -inf }
 0x382   :  { %1042 = vmax.xlane.f32.xlu0 %v1041_v33 }
 0x3f5   :  { %v1043_v13 = vpop.xlane.xlu0 %1042 }
 0x3f6   :  { %v1044_v35 = vsub.f32 %v1040_v32, %v1043_v13 }
 0x3f8   :  { %v1045_v36 = vmul.f32 1.442695, %v1044_v35 }
 0x3fa   :  { %1385 = vpow2.f32 %v1045_v36 }
 0x400   :  { %v1386_v25 = vpop.eup %1385 }
 0x401   :  { %v1047_v41 = vsel %vm95_vm0, %v1386_v25, 0.0 }
 0x402   :  { %1048 = vadd.xlane.f32.xlu1 %v1047_v41 }
 0x475   :  { %v1049_v40 = vpop.xlane.xlu1 %1048 }
 0x476   :  { %1387 = vrcp.f32 %v1049_v40 }
 0x47c   :  { %v1388_v44 = vpop.eup %1387 }
 0x47d   :  { %v1051_v45 = vmul.f32 %v1388_v44, %v1386_v25 }
 0x47f   :  { %1052 = vst.msk [vmem:[#allocation9] sm:$0xff] %vm95_vm0, %v1051_v45  ;;  %v1067_v43 = vperm.slane %v1051_v45, 2  ;;  %v1060_v46 = vperm.slane %v1051_v45, 1  ;;  %v1053_v47 = vperm.slane %v1051_v45, 0  ;;  %v1081_v17 = vperm.slane %v1051_v45, 4 }
 0x480   :  { %v1074_v55 = vperm.slane %v1051_v45, 3  ;;  %v1095_v50 = vperm.slane %v1051_v45, 6  ;;  %v1088_v51 = vperm.slane %v1051_v45, 5  ;;  %1203 = dma.vmem_to_hbm [thread:$0]  %s1199_s20, 128, %s1201_s19, [#allocation10]   ;;  %v1102_v54 = vperm.slane %v1051_v45, 7 }
 0x481   :  { %1072 = vperm.xlu1 %1366, %v1067_v43   ;;  %1065 = vperm.xlu0 %1365, %v1060_v46   ;;  %1214 = dma.vmem_to_hbm [thread:$0]  %s1210_s22, 128, %s1212_s24, [#allocation10]  }
 0x482   :  { %1058 = vperm.xlu2 %1364, %v1053_v47  }
 0x489   :  { %1086 = vperm.xlu1 %1366, %v1081_v17  }
 0x48a   :  { %1079 = vperm.xlu2 %1364, %v1074_v55  }
 0x491   :  { %1100 = vperm.xlu1 %1366, %v1095_v50  }
 0x492   :  { %1093 = vperm.xlu2 %1364, %v1088_v51  }
 0x49a   :  { %1107 = vperm.xlu2 %1364, %v1102_v54  }
 0x4dc   :  { %v1059_v48 = vpop.permute.xlu2 %1058 }
 0x4dd   :  { %v1109_v57 = vmul.f32 %v1389_v42, %v1059_v48 }
 0x4df   :  { %v1117_v39 = vrot.slane %v1109_v57, 4 }
 0x4e1   :  { %v1118_v22 = vadd.f32 %v1117_v39, %v1109_v57 }
 0x4e3   :  { %v1119_v23 = vrot.slane %v1118_v22, 2 }
 0x4e4   :  { %v1080_v56 = vpop.permute.xlu2 %1079 }
 0x4e5   :  { %v1112_v59 = vmul.f32 %v1080_v56, %v1743_v38  ;;  %v1120_v6 = vadd.f32 %v1119_v23, %v1118_v22 }
 0x4e7   :  { %v1135_v16 = vrot.slane %v1112_v59, 4  ;;  %v1121_v24 = vrot.slane %v1120_v6, 1 }
 0x4ec   :  { %v1094_v62 = vpop.permute.xlu2 %1093 }
 0x4ed   :  { %v1114_v58 = vmul.f32 %v1094_v62, %v1763_v53 }
 0x4ef   :  { %v1147_v26 = vrot.slane %v1114_v58, 4 }
 0x4f1   :  { %v1148_v29 = vadd.f32 %v1147_v26, %v1114_v58 }
 0x4f3   :  { %v1073_v28 = vpop.permute.xlu1 %1072  ;;  %v1066_v19 = vpop.permute.xlu0 %1065  ;;  %v1149_v60 = vrot.slane %v1148_v29, 2 }
 0x4f4   :  { %v1111_v63 = vmul.f32 %v1073_v28, %v1738_v37  ;;  %v1110_v4 = vmul.f32 %v1390_v0, %v1066_v19  ;;  %v1108_v15 = vpop.permute.xlu2 %1107  ;;  %v1136_v37 = vadd.f32 %v1135_v16, %v1112_v59 }
 0x4f5   :  { %v1116_v38 = vmul.f32 %v1108_v15, %v1778_v5  ;;  %v1150_v44 = vadd.f32 %v1149_v60, %v1148_v29 }
 0x4f6   :  { %v1129_v11 = vrot.slane %v1111_v63, 4  ;;  %v1123_v14 = vrot.slane %v1110_v4, 4  ;;  %v1137_v8 = vrot.slane %v1136_v37, 2 }
 0x4f7   :  { %v1159_v3 = vrot.slane %v1116_v38, 4  ;;  %v1151_v51 = vrot.slane %v1150_v44, 1 }
 0x4f8   :  { %v1130_v18 = vadd.f32 %v1129_v11, %v1111_v63  ;;  %v1124_v20 = vadd.f32 %v1123_v14, %v1110_v4  ;;  %v1138_v31 = vadd.f32 %v1137_v8, %v1136_v37 }
 0x4f9   :  { %v1160_v30 = vadd.f32 %v1159_v3, %v1116_v38  ;;  %v1152_v42 = vadd.f32 %v1151_v51, %v1150_v44 }
 0x4fa   :  { %v1131_v21 = vrot.slane %v1130_v18, 2  ;;  %v1125_v61 = vrot.slane %v1124_v20, 2  ;;  %v1139_v40 = vrot.slane %v1138_v31, 1 }
 0x4fb   :  { %v1087_v27 = vpop.permute.xlu1 %1086  ;;  %v1161_v36 = vrot.slane %v1160_v30, 2 }
 0x4fc   :  { %v1126_v2 = vadd.f32 %v1125_v61, %v1124_v20  ;;  %v1113_v1 = vmul.f32 %v1087_v27, %v1758_v52  ;;  %v1132_v7 = vadd.f32 %v1131_v21, %v1130_v18  ;;  %v1122_v52 = vadd.f32 %v1121_v24, %v1120_v6 }
 0x4fd   :  { %v1162_v46 = vadd.f32 %v1161_v36, %v1160_v30  ;;  %v1140_v50 = vadd.f32 %v1139_v40, %v1138_v31 }
 0x4fe   :  { %v1141_v9 = vrot.slane %v1113_v1, 4  ;;  %v1127_v53 = vrot.slane %v1126_v2, 1  ;;  %v1133_v49 = vrot.slane %v1132_v7, 1 }
 0x4ff   :  { %v1163_v48 = vrot.slane %v1162_v46, 1 }
 0x500   :  { %v1142_v10 = vadd.f32 %v1141_v9, %v1113_v1  ;;  %v1128_v32 = vadd.f32 %v1127_v53, %v1126_v2  ;;  %v1134_v25 = vadd.f32 %v1133_v49, %v1132_v7 }
 0x501   :  { %v1164_v39 = vadd.f32 %v1163_v48, %v1162_v46 }
 0x502   :  { %v1143_v5 = vrot.slane %v1142_v10, 2  ;;  %v1173_v45 = vsel %vm931_vm2, %v1128_v32, %v1122_v52 }
 0x503   :  { %v1101_v33 = vpop.permute.xlu1 %1100  ;;  %v1174_v47 = vsel %vm933_vm3, %v1134_v25, %v1173_v45 }
 0x504   :  { %v1144_v13 = vadd.f32 %v1143_v5, %v1142_v10  ;;  %v1115_v35 = vmul.f32 %v1101_v33, %v1783_v12  ;;  %v1175_v12 = vsel %vm935_vm4, %v1140_v50, %v1174_v47 }
 0x506   :  { %v1145_v41 = vrot.slane %v1144_v13, 1  ;;  %v1153_v34 = vrot.slane %v1115_v35, 4 }
 0x508   :  { %v1154_v43 = vadd.f32 %v1153_v34, %v1115_v35  ;;  %v1146_v17 = vadd.f32 %v1145_v41, %v1144_v13 }
 0x50a   :  { %v1155_v55 = vrot.slane %v1154_v43, 2  ;;  %v1176_v56 = vsel %vm937_vm5, %v1146_v17, %v1175_v12 }
 0x50b   :  { %v1177_v59 = vsel %vm939_vm6, %v1152_v42, %v1176_v56 }
 0x50c   :  { %v1156_v54 = vadd.f32 %v1155_v55, %v1154_v43 }
 0x50e   :  { %v1157_v62 = vrot.slane %v1156_v54, 1 }
 0x510   :  { %v1158_v57 = vadd.f32 %v1157_v62, %v1156_v54 }
 0x512   :  { %v1178_v28 = vsel %vm941_vm7, %v1158_v57, %v1177_v59 }
 0x513   :  { %v1179_v19 = vsel %vm943_vm8, %v1164_v39, %v1178_v28 }
 0x514   :  { %1181 = vst [vmem:[#allocation8] sm:$0xff] %v1179_v19 }
 0x515   :  { %1192 = dma.vmem_to_hbm [thread:$0]  %s1188_s15, 128, %s1190_s14, [#allocation4]  }
 0x516   :  { %1563 = dma.done.wait [#allocation4], 128  }
 0x517   :  { %1564 = vsyncadd [#allocation4], 4294967168 }
 0x518   :  { %1565 = dma.done.wait [#allocation10], 256  }
 0x519   :  { %1566 = vsyncadd [#allocation10], 4294967040 }
 0x51a   :  { %1567 = dma.done.wait [#allocation13], 1024  }
 0x51b   :  { %1568 = vsyncadd [#allocation13], 4294966272 }
 0x51c   :  { %1244 = vsyncpa [#allocation3], 1 }
 0x51d   :  { %1245 = vsyncpa [#allocation6], 1 }
 0x51e   :  { %1246 = vsyncpa [#allocation4], 1 }
 0x51f   :  { %1247 = vsyncpa [#allocation10], 1 }
 0x520   :  { %1248 = vsyncpa [#allocation13], 1 }

</bundles_post_ra>
